<compile_context>
chip_gen: v5e
topology: v5e:2x2
jax: 0.10.0
libtpu: 0.0.40
codegen_flags: <defaults>
</compile_context>

<pallas_src>
import functools
import math

import jax
import jax.numpy as jnp
from jax.experimental import pallas as pl
from jax.experimental.pallas import tpu as pltpu

_LANE = 128


def _round_up(n, m):
    return ((n + m - 1) // m) * m


def _pad_axis(a, target, axis, value=0.0):
    pad = target - a.shape[axis]
    if pad <= 0:
        return a
    widths = [(0, 0)] * a.ndim
    widths[axis] = (0, pad)
    return jnp.pad(a, widths, constant_values=value)


def _mlp_softmax_kernel(x_ref, w1_ref, b1_ref, w2_ref, b2_ref, w3_ref, b3_ref,
                        o_ref, *, out_size):
    """Fused fc1+relu -> fc2+relu -> fc3 -> softmax on one batch tile."""
    cd = w1_ref.dtype                       # MXU operand dtype (f32 or bf16)
    x = x_ref[...].astype(cd)

    # fc1 + ReLU (MXU matmul, f32 accumulate, f32 bias)
    h1 = jnp.dot(x, w1_ref[...], preferred_element_type=jnp.float32)
    h1 = jnp.maximum(h1 + b1_ref[...], 0.0).astype(cd)

    # fc2 + ReLU
    h2 = jnp.dot(h1, w2_ref[...], preferred_element_type=jnp.float32)
    h2 = jnp.maximum(h2 + b2_ref[...], 0.0).astype(cd)

    # fc3 logits: lane-dense 128-wide MXU pass, then keep only the real lanes
    logits = jnp.dot(h2, w3_ref[...], preferred_element_type=jnp.float32)
    logits = (logits + b3_ref[...])[:, :out_size]

    # numerically-stable softmax over the real output lanes; exact normalise
    m = jnp.max(logits, axis=-1, keepdims=True)
    e = jnp.exp(logits - m)
    o_ref[...] = (e / jnp.sum(e, axis=-1, keepdims=True)).astype(o_ref.dtype)


def prepare_params(params, compute_dtype=jnp.bfloat16):
    """Pad (lane-dense) + cast the weights ONCE.  Cache the result and reuse
    it across forward calls; biases stay f32 (softmax / accumulation is f32)."""
    hidden = params["w1"].shape[1]
    d_out = params["w3"].shape[1]
    hidden_p = _round_up(hidden, _LANE)
    d_out_p = _round_up(d_out, _LANE)

    w1 = _pad_axis(params["w1"], hidden_p, 1).astype(compute_dtype)
    b1 = _pad_axis(params["b1"].reshape(1, -1).astype(jnp.float32), hidden_p, 1)

    w2 = _pad_axis(_pad_axis(params["w2"], hidden_p, 0), hidden_p, 1)
    w2 = w2.astype(compute_dtype)
    b2 = _pad_axis(params["b2"].reshape(1, -1).astype(jnp.float32), hidden_p, 1)

    w3 = _pad_axis(_pad_axis(params["w3"], hidden_p, 0), d_out_p, 1)
    w3 = w3.astype(compute_dtype)
    b3 = _pad_axis(params["b3"].reshape(1, -1).astype(jnp.float32), d_out_p, 1)

    return {"w1": w1, "b1": b1, "w2": w2, "b2": b2, "w3": w3, "b3": b3}


@functools.partial(jax.jit, static_argnames=("out_size",))
def reinforce_forward(x, prep, out_size):
    """x: [B, d_in]; prep: output of prepare_params. Returns probs [B, out_size] (f32)."""
    B, d_in = x.shape
    hidden_p = prep["w1"].shape[1]
    d_out_p = prep["w3"].shape[1]

    # Batch tiling: one tile for small B; for larger B use >=2 tiles (so v7x's
    # two TensorCores both get work), capped at 1024 rows per tile.
    if B <= 128:
        batch_tile = _round_up(B, 8)
    else:
        batch_tile = min(1024, _round_up(pl.cdiv(B, 2), 16))
    grid = (pl.cdiv(B, batch_tile),)

    # weights/biases: constant index maps -> DMA'd once, resident in VMEM
    full = lambda shape: pl.BlockSpec(shape, lambda i: (0, 0))

    weight_bytes = sum(int(v.size) * v.dtype.itemsize for v in prep.values())
    cost = pl.CostEstimate(
        flops=2 * B * (d_in * hidden_p + hidden_p * hidden_p
                       + hidden_p * d_out_p),
        transcendentals=B * out_size,
        bytes_accessed=int(x.size) * x.dtype.itemsize
                       + B * out_size * 4 + weight_bytes,
    )

    kernel = functools.partial(_mlp_softmax_kernel, out_size=out_size)

    return pl.pallas_call(
        kernel,
        out_shape=jax.ShapeDtypeStruct((B, out_size), jnp.float32),
        grid_spec=pltpu.PrefetchScalarGridSpec(
            num_scalar_prefetch=0,
            grid=grid,
            in_specs=[
                pl.BlockSpec((batch_tile, d_in), lambda i: (i, 0)),  # x tile
                full((d_in, hidden_p)),                              # w1
                full((1, hidden_p)),                                 # b1
                full((hidden_p, hidden_p)),                          # w2
                full((1, hidden_p)),                                 # b2
                full((hidden_p, d_out_p)),                           # w3
                full((1, d_out_p)),                                  # b3
            ],
            out_specs=pl.BlockSpec((batch_tile, out_size), lambda i: (i, 0)),
        ),
        compiler_params=pltpu.CompilerParams(
            dimension_semantics=("parallel",)),
        cost_estimate=cost,
    )(x, prep["w1"], prep["b1"], prep["w2"], prep["b2"], prep["w3"], prep["b3"])


def init_params(key, input_size, output_size, hidden=64):
    """Mirrors the PyTorch module:
       fc1/fc2 weights: kaiming_uniform_(nonlinearity='relu')
       fc3 weight + all biases: PyTorch default Linear init.
       Weights stored as [fan_in, fan_out] (transposed vs torch)."""
    k = jax.random.split(key, 6)

    def kaiming_uniform(key, fan_in, fan_out):
        gain = math.sqrt(2.0)
        bound = gain * math.sqrt(3.0 / fan_in)
        return jax.random.uniform(key, (fan_in, fan_out), jnp.float32,
                                  -bound, bound)

    def default_linear_w(key, fan_in, fan_out):
        bound = 1.0 / math.sqrt(fan_in)
        return jax.random.uniform(key, (fan_in, fan_out), jnp.float32,
                                  -bound, bound)

    def default_bias(key, fan_in, fan_out):
        bound = 1.0 / math.sqrt(fan_in)
        return jax.random.uniform(key, (fan_out,), jnp.float32, -bound, bound)

    return {
        "w1": kaiming_uniform(k[0], input_size, hidden),
        "b1": default_bias(k[1], input_size, hidden),
        "w2": kaiming_uniform(k[2], hidden, hidden),
        "b2": default_bias(k[3], hidden, hidden),
        "w3": default_linear_w(k[4], hidden, output_size),
        "b3": default_bias(k[5], hidden, output_size),
    }


def _reference_forward(x, p):
    h1 = jnp.maximum(x @ p["w1"] + p["b1"], 0.0)
    h2 = jnp.maximum(h1 @ p["w2"] + p["b2"], 0.0)
    logits = h2 @ p["w3"] + p["b3"]
    return jax.nn.softmax(logits, axis=-1)


if __name__ == "__main__":
    key = jax.random.PRNGKey(0)
    kp, kx = jax.random.split(key)

    batch = 8
    input_size = 32
    output_size = 8

    params = init_params(kp, input_size, output_size)
    x = jax.random.normal(kx, (batch, input_size), jnp.float32)
    ref = _reference_forward(x, params)

    # f32 MXU-operand path
    prep_f32 = prepare_params(params, compute_dtype=jnp.float32)
    probs = jax.block_until_ready(reinforce_forward(x, prep_f32, output_size))
    assert probs.shape == (batch, output_size)
    assert bool(jnp.all(jnp.isfinite(probs)))
    assert jnp.allclose(jnp.sum(probs, axis=-1), 1.0, atol=1e-3)
    assert jnp.allclose(probs, ref, atol=2e-3, rtol=2e-3)

    # bf16 MXU-operand path (default), f32 accumulation / bias / softmax
    prep_bf16 = prepare_params(params)                 # compute_dtype=bfloat16
    probs_bf16 = jax.block_until_ready(
        reinforce_forward(x, prep_bf16, output_size))
    assert probs_bf16.shape == (batch, output_size)
    assert jnp.allclose(jnp.sum(probs_bf16, axis=-1), 1.0, atol=1e-3)
    assert jnp.allclose(probs_bf16, ref, atol=3e-2, rtol=5e-2)

    # Larger, non-divisible batch exercises the multi-tile grid + partial
    # tail-block path (no wrapper padding, no output slice).
    xb = jax.random.normal(jax.random.PRNGKey(1), (300, input_size),
                           jnp.float32)
    refb = _reference_forward(xb, params)
    pb = jax.block_until_ready(reinforce_forward(xb, prep_f32, output_size))
    assert pb.shape == (300, output_size)
    assert jnp.allclose(jnp.sum(pb, axis=-1), 1.0, atol=1e-3)
    assert jnp.allclose(pb, refb, atol=2e-3, rtol=2e-3)

    print("KERNEL_OK")
</pallas_src>

<mosaic_0001>
module attributes {stable_mosaic.version = 11 : i64} {
  func.func @_mlp_softmax_kernel(%arg0: i32, %arg1: memref<8x32xf32, #tpu.memory_space<vmem>>, %arg2: memref<32x128xf32, #tpu.memory_space<vmem>>, %arg3: memref<1x128xf32, #tpu.memory_space<vmem>>, %arg4: memref<128x128xf32, #tpu.memory_space<vmem>>, %arg5: memref<1x128xf32, #tpu.memory_space<vmem>>, %arg6: memref<128x128xf32, #tpu.memory_space<vmem>>, %arg7: memref<1x128xf32, #tpu.memory_space<vmem>>, %arg8: memref<8x8xf32, #tpu.memory_space<vmem>>) attributes {dimension_semantics = [#tpu.dimension_semantics<parallel>], iteration_bounds = array<i64: 1>, scalar_prefetch = 0 : i64, scratch_operands = 0 : i64, tpu.core_type = #tpu.core_type<tc>, window_params = [{transform_indices = @transform_0, window_bounds = array<i64: 8, 32>}, {pipeline_mode = #tpu.pipeline_mode<synchronous>, transform_indices = @transform_1, window_bounds = array<i64: 32, 128>}, {pipeline_mode = #tpu.pipeline_mode<synchronous>, transform_indices = @transform_2, window_bounds = array<i64: 1, 128>}, {pipeline_mode = #tpu.pipeline_mode<synchronous>, transform_indices = @transform_3, window_bounds = array<i64: 128, 128>}, {pipeline_mode = #tpu.pipeline_mode<synchronous>, transform_indices = @transform_4, window_bounds = array<i64: 1, 128>}, {pipeline_mode = #tpu.pipeline_mode<synchronous>, transform_indices = @transform_5, window_bounds = array<i64: 128, 128>}, {pipeline_mode = #tpu.pipeline_mode<synchronous>, transform_indices = @transform_6, window_bounds = array<i64: 1, 128>}, {transform_indices = @transform_7, window_bounds = array<i64: 8, 8>}]} {
    %c0 = arith.constant 0 : index
    %c0_0 = arith.constant 0 : index
    %0 = vector.load %arg1[%c0, %c0_0] : memref<8x32xf32, #tpu.memory_space<vmem>>, vector<8x32xf32>
    %c0_1 = arith.constant 0 : index
    %c0_2 = arith.constant 0 : index
    %1 = vector.load %arg2[%c0_1, %c0_2] : memref<32x128xf32, #tpu.memory_space<vmem>>, vector<32x128xf32>
    %cst = arith.constant dense<0.000000e+00> : vector<8x128xf32>
    %2 = tpu.matmul %0, %1, %cst {dimension_numbers = #tpu.dot_dimension_numbers<[1], [0], [0], [1], [0, 0, 1, 1], [], []>} : vector<8x32xf32>, vector<32x128xf32>, vector<8x128xf32> -> vector<8x128xf32>
    %c0_3 = arith.constant 0 : index
    %c0_4 = arith.constant 0 : index
    %3 = vector.load %arg3[%c0_3, %c0_4] : memref<1x128xf32, #tpu.memory_space<vmem>>, vector<1x128xf32>
    %4 = vector.broadcast %3 : vector<1x128xf32> to vector<8x128xf32>
    %5 = arith.addf %2, %4 : vector<8x128xf32>
    %cst_5 = arith.constant 0.000000e+00 : f32
    %6 = vector.broadcast %cst_5 : f32 to vector<8x128xf32>
    %7 = arith.maximumf %5, %6 : vector<8x128xf32>
    %c0_6 = arith.constant 0 : index
    %c0_7 = arith.constant 0 : index
    %8 = vector.load %arg4[%c0_6, %c0_7] : memref<128x128xf32, #tpu.memory_space<vmem>>, vector<128x128xf32>
    %cst_8 = arith.constant dense<0.000000e+00> : vector<8x128xf32>
    %9 = tpu.matmul %7, %8, %cst_8 {dimension_numbers = #tpu.dot_dimension_numbers<[1], [0], [0], [1], [0, 0, 1, 1], [], []>} : vector<8x128xf32>, vector<128x128xf32>, vector<8x128xf32> -> vector<8x128xf32>
    %c0_9 = arith.constant 0 : index
    %c0_10 = arith.constant 0 : index
    %10 = vector.load %arg5[%c0_9, %c0_10] : memref<1x128xf32, #tpu.memory_space<vmem>>, vector<1x128xf32>
    %11 = vector.broadcast %10 : vector<1x128xf32> to vector<8x128xf32>
    %12 = arith.addf %9, %11 : vector<8x128xf32>
    %cst_11 = arith.constant 0.000000e+00 : f32
    %13 = vector.broadcast %cst_11 : f32 to vector<8x128xf32>
    %14 = arith.maximumf %12, %13 : vector<8x128xf32>
    %c0_12 = arith.constant 0 : index
    %c0_13 = arith.constant 0 : index
    %15 = vector.load %arg6[%c0_12, %c0_13] : memref<128x128xf32, #tpu.memory_space<vmem>>, vector<128x128xf32>
    %cst_14 = arith.constant dense<0.000000e+00> : vector<8x128xf32>
    %16 = tpu.matmul %14, %15, %cst_14 {dimension_numbers = #tpu.dot_dimension_numbers<[1], [0], [0], [1], [0, 0, 1, 1], [], []>} : vector<8x128xf32>, vector<128x128xf32>, vector<8x128xf32> -> vector<8x128xf32>
    %c0_15 = arith.constant 0 : index
    %c0_16 = arith.constant 0 : index
    %17 = vector.load %arg7[%c0_15, %c0_16] : memref<1x128xf32, #tpu.memory_space<vmem>>, vector<1x128xf32>
    %18 = vector.broadcast %17 : vector<1x128xf32> to vector<8x128xf32>
    %19 = arith.addf %16, %18 : vector<8x128xf32>
    %20 = vector.extract_strided_slice %19 {offsets = [0, 0], sizes = [8, 8], strides = [1, 1]} : vector<8x128xf32> to vector<8x8xf32>
    %cst_17 = arith.constant dense<0xFF800000> : vector<8xf32>
    %21 = vector.multi_reduction <maximumf>, %20, %cst_17 [1] : vector<8x8xf32> to vector<8xf32>
    %22 = vector.shape_cast %21 : vector<8xf32> to vector<8x1xf32>
    %23 = vector.broadcast %22 : vector<8x1xf32> to vector<8x8xf32>
    %24 = arith.subf %20, %23 : vector<8x8xf32>
    %25 = math.exp %24 : vector<8x8xf32>
    %cst_18 = arith.constant dense<0.000000e+00> : vector<8xf32>
    %26 = vector.multi_reduction <add>, %25, %cst_18 [1] : vector<8x8xf32> to vector<8xf32>
    %27 = vector.shape_cast %26 : vector<8xf32> to vector<8x1xf32>
    %28 = vector.broadcast %27 : vector<8x1xf32> to vector<8x8xf32>
    %29 = arith.divf %25, %28 : vector<8x8xf32>
    %c0_19 = arith.constant 0 : index
    %c0_20 = arith.constant 0 : index
    %30 = vector.load %arg8[%c0_19, %c0_20] : memref<8x8xf32, #tpu.memory_space<vmem>>, vector<8x8xf32>
    tpu.vector_store %arg8[%c0_19, %c0_20], %29 {strides = array<i32>} : memref<8x8xf32, #tpu.memory_space<vmem>>, vector<8x8xf32>,
    return
  }
  func.func @transform_0(%arg0: i32) -> (i32, i32) {
    %c0_i32 = arith.constant 0 : i32
    %c0_i32_0 = arith.constant 0 : i32
    return %arg0, %c0_i32 : i32, i32
  }
  func.func @transform_1(%arg0: i32) -> (i32, i32) {
    %c0_i32 = arith.constant 0 : i32
    %c0_i32_0 = arith.constant 0 : i32
    %c0_i32_1 = arith.constant 0 : i32
    return %c0_i32, %c0_i32_0 : i32, i32
  }
  func.func @transform_2(%arg0: i32) -> (i32, i32) {
    %c0_i32 = arith.constant 0 : i32
    %c0_i32_0 = arith.constant 0 : i32
    %c0_i32_1 = arith.constant 0 : i32
    return %c0_i32, %c0_i32_0 : i32, i32
  }
  func.func @transform_3(%arg0: i32) -> (i32, i32) {
    %c0_i32 = arith.constant 0 : i32
    %c0_i32_0 = arith.constant 0 : i32
    %c0_i32_1 = arith.constant 0 : i32
    return %c0_i32, %c0_i32_0 : i32, i32
  }
  func.func @transform_4(%arg0: i32) -> (i32, i32) {
    %c0_i32 = arith.constant 0 : i32
    %c0_i32_0 = arith.constant 0 : i32
    %c0_i32_1 = arith.constant 0 : i32
    return %c0_i32, %c0_i32_0 : i32, i32
  }
  func.func @transform_5(%arg0: i32) -> (i32, i32) {
    %c0_i32 = arith.constant 0 : i32
    %c0_i32_0 = arith.constant 0 : i32
    %c0_i32_1 = arith.constant 0 : i32
    return %c0_i32, %c0_i32_0 : i32, i32
  }
  func.func @transform_6(%arg0: i32) -> (i32, i32) {
    %c0_i32 = arith.constant 0 : i32
    %c0_i32_0 = arith.constant 0 : i32
    %c0_i32_1 = arith.constant 0 : i32
    return %c0_i32, %c0_i32_0 : i32, i32
  }
  func.func @transform_7(%arg0: i32) -> (i32, i32) {
    %c0_i32 = arith.constant 0 : i32
    %c0_i32_0 = arith.constant 0 : i32
    return %arg0, %c0_i32 : i32, i32
  }
}

</mosaic_0001>

<bundles_post_ra>
// kernel: reinforce_forward.1
= control target key start
LH: loop header
LB: loop body
LE: loop exit
PB: predicated region body
PF: predicated region fallthrough
CT: control target
= control target key end

     0   :  { %12 = vsyncpa [#allocation3], 0  ;;  %s504_s0 = inlined_call_operand.hbm [shape: f32[8,32], index: 0, kind: input, shape index: {}]   ;;  %s505_s1 = inlined_call_operand.hbm [shape: f32[32,128], index: 1, kind: input, shape index: {}]   ;;  %s506_s2 = inlined_call_operand.hbm [shape: f32[1,128], index: 2, kind: input, shape index: {}]   ;;  %s507_s3 = inlined_call_operand.hbm [shape: f32[128,128], index: 3, kind: input, shape index: {}]   ;;  %s508_s4 = inlined_call_operand.vmem [shape: f32[1,128], index: 4, kind: input, shape index: {}]   ;;  %s509_s5 = inlined_call_operand.hbm [shape: f32[128,128], index: 5, kind: input, shape index: {}]   ;;  %s510_s6 = inlined_call_operand.vmem [shape: f32[1,128], index: 6, kind: input, shape index: {}]   ;;  %s511_s7 = inlined_call_operand.hbm [shape: f32[8,8], index: 7, kind: output, shape index: {}]  }
   0x1   :  { %13 = vsyncpa [#allocation6], 0 }
   0x2   :  { %14 = vsyncpa [#allocation9], 0  ;;  %s31_s26 = sshll.u32 %s505_s1, 4  ;;  %s32_s26 = int_to_ptr.hbm [resolvable:$true] %s31_s26 }
   0x3   :  { %15 = vsyncpa [#allocation4], 0  ;;  %s429_s27 = smov [#allocation5]   ;;  %s55_s8 = sshll.u32 %s507_s3, 4  ;;  %s56_s8 = int_to_ptr.hbm [resolvable:$true] %s55_s8 }
   0x4   :  { %s33_s28 = sshll.u32 %s429_s27, 4  ;;  %s430_s9 = smov 128   ;;  %s34_s28 = int_to_ptr.vmem [resolvable:$true] %s33_s28 }
   0x5   :  { %s431_s10 = smov 8   ;;  %s432_s11 = smov [#allocation8]  }
   0x6   :  { %39 = dma.hbm_to_vmem [thread:$0]  %s32_s26, 512, %s34_s28, [#allocation6], %s430_s9, %s430_s9, %s431_s10  }
   0x7   :  { %s57_s12 = sshll.u32 %s432_s11, 4  ;;  %s21_s15 = sshll.u32 %s504_s0, 4  ;;  %s58_s12 = int_to_ptr.vmem [resolvable:$true] %s57_s12  ;;  %s22_s15 = int_to_ptr.hbm [resolvable:$true] %s21_s15 }
   0x8   :  { %63 = dma.hbm_to_vmem [thread:$0]  %s56_s8, 2048, %s58_s12, [#allocation9], %s430_s9, %s430_s9, %s431_s10  }
   0x9   :  { %s45_s17 = sshll.u32 %s506_s2, 4  ;;  %s433_s18 = smov [#allocation2]   ;;  %s46_s17 = int_to_ptr.hbm [resolvable:$true] %s45_s17 }
   0xa   :  { %s23_s19 = sshll.u32 %s433_s18, 4  ;;  %s434_s3 = smov [#allocation7]   ;;  %s24_s19 = int_to_ptr.vmem [resolvable:$true] %s23_s19 }
   0xb   :  { %26 = dma.hbm_to_vmem [thread:$0]  %s22_s15, 128, %s24_s19, [#allocation3]  }
   0xc   :  { %s47_s20 = sshll.u32 %s434_s3, 4  ;;  %s70_s23 = sshll.u32 %s509_s5, 4  ;;  %s48_s20 = int_to_ptr.vmem [resolvable:$true] %s47_s20  ;;  %s71_s23 = int_to_ptr.hbm [resolvable:$true] %s70_s23 }
   0xd   :  { %50 = dma.hbm_to_vmem [thread:$0]  %s46_s17, 16, %s48_s20, [#allocation6]  }
   0xe   :  { %s435_s0 = smov [#allocation10]  }
   0xf   :  { %s72_s24 = sshll.u32 %s435_s0, 4  ;;  %s73_s24 = int_to_ptr.vmem [resolvable:$true] %s72_s24 }
  0x10   :  { %78 = dma.hbm_to_vmem [thread:$0]  %s71_s23, 2048, %s73_s24, [#allocation9], %s430_s9, %s430_s9, %s431_s10  }
  0x11   :  { %421 = dma.done.wait [#allocation3], 128  }
  0x12   :  { %422 = vsyncadd [#allocation3], 4294967168 }
  0x13   :  { %423 = dma.done.wait [#allocation6], 528  }
  0x14   :  { %424 = vsyncadd [#allocation6], 4294966768 }
  0x15   :  { %425 = dma.done.wait [#allocation9], 4096  }
  0x16   :  { %426 = vsyncadd [#allocation9], 4294963200  ;;  %v105_v0 = vld [vmem:[#allocation5 + $0x18] sm:$0xff]  ;;  %v104_v1 = vld [vmem:[#allocation5 + $0x10] sm:$0xff]  ;;  %vm110_vm0 = vcmask 261120   ;;  %vm216_vm1 = vcmask 64512  }
  0x17   :  { %126 = vmatpush.msra.mxu0 %v105_v0  ;;  %v150_v2 = vld [vmem:[#allocation8 + $0x78] sm:$0xff]  ;;  %v103_v3 = vld [vmem:[#allocation5 + $0x8] sm:$0xff]  ;;  %v149_v4 = vld [vmem:[#allocation8 + $0x70] sm:$0xff]  ;;  %s249_s29 = sshll.u32 %s511_s7, 4  ;;  %s250_s29 = int_to_ptr.hbm [resolvable:$true] %s249_s29 }
  0x18   :  { %155 = vmatpush.msra.mxu1 %v150_v2  ;;  %v148_v5 = vld [vmem:[#allocation8 + $0x68] sm:$0xff]  ;;  %v102_v6 = vld [vmem:[#allocation5] sm:$0xff]  ;;  %v101_v7 = vld [vmem:[#allocation2] sm:$0xff] }
  0x19   :  { %127 = vmatpush.msra.mxu0 %v104_v1  ;;  %v147_v8 = vld [vmem:[#allocation8 + $0x60] sm:$0xff]  ;;  %v146_v9 = vld [vmem:[#allocation8 + $0x58] sm:$0xff]  ;;  %v145_v10 = vld [vmem:[#allocation8 + $0x50] sm:$0xff] }
  0x1a   :  { %156 = vmatpush.msra.mxu1 %v149_v4  ;;  %v144_v11 = vld [vmem:[#allocation8 + $0x48] sm:$0xff]  ;;  %v143_v12 = vld [vmem:[#allocation8 + $0x40] sm:$0xff]  ;;  %v142_v13 = vld [vmem:[#allocation8 + $0x38] sm:$0xff] }
  0x1b   :  { %128 = vmatpush.msra.mxu0 %v103_v3  ;;  %v141_v14 = vld [vmem:[#allocation8 + $0x30] sm:$0xff]  ;;  %v140_v15 = vld [vmem:[#allocation8 + $0x28] sm:$0xff]  ;;  %v139_v16 = vld [vmem:[#allocation8 + $0x20] sm:$0xff] }
  0x1c   :  { %157 = vmatpush.msra.mxu1 %v148_v5  ;;  %v138_v17 = vld [vmem:[#allocation8 + $0x18] sm:$0xff]  ;;  %v137_v18 = vld [vmem:[#allocation8 + $0x10] sm:$0xff]  ;;  %v136_v19 = vld [vmem:[#allocation8 + $0x8] sm:$0xff] }
  0x1d   :  { %129 = vmatpush.msra.mxu0 %v102_v6  ;;  %v135_v20 = vld [vmem:[#allocation8] sm:$0xff]  ;;  %v191_v21 = vld [vmem:[#allocation10 + $0x78] sm:$0xff]  ;;  %v190_v22 = vld [vmem:[#allocation10 + $0x70] sm:$0xff] }
  0x1e   :  { %261 = vmatmul.msk.f32.vlgmr.msra.gmra.mxu0 %vm110_vm0, %v101_v7  ;;  %158 = vmatpush.msra.mxu1 %v147_v8  ;;  %v189_v23 = vld [vmem:[#allocation10 + $0x68] sm:$0xff]  ;;  %v188_v24 = vld [vmem:[#allocation10 + $0x60] sm:$0xff]  ;;  %v187_v25 = vld [vmem:[#allocation10 + $0x58] sm:$0xff] }
  0x1f   :  { %196 = vmatpush.msra.mxu2 %v191_v21  ;;  %v186_v26 = vld [vmem:[#allocation10 + $0x50] sm:$0xff]  ;;  %v185_v27 = vld [vmem:[#allocation10 + $0x48] sm:$0xff]  ;;  %v184_v28 = vld [vmem:[#allocation10 + $0x40] sm:$0xff] }
  0x20   :  { %159 = vmatpush.msra.mxu1 %v146_v9  ;;  %v183_v29 = vld [vmem:[#allocation10 + $0x38] sm:$0xff]  ;;  %v182_v30 = vld [vmem:[#allocation10 + $0x30] sm:$0xff]  ;;  %v181_v31 = vld [vmem:[#allocation10 + $0x28] sm:$0xff] }
  0x21   :  { %197 = vmatpush.msra.mxu2 %v190_v22  ;;  %v180_v32 = vld [vmem:[#allocation10 + $0x20] sm:$0xff]  ;;  %v179_v33 = vld [vmem:[#allocation10 + $0x18] sm:$0xff]  ;;  %v178_v38 = vld [vmem:[#allocation10 + $0x10] sm:$0xff] }
  0x22   :  { %160 = vmatpush.msra.mxu1 %v145_v10  ;;  %v270_v34 = vld [vmem:[#allocation7] ss:$0 sm:$0xff]  ;;  %v177_v39 = vld [vmem:[#allocation10 + $0x8] sm:$0xff]  ;;  %v176_v40 = vld [vmem:[#allocation10] sm:$0xff] }
  0x23   :  { %198 = vmatpush.msra.mxu2 %v189_v23  ;;  %v271_v41 = vld [vmem:[%s508_s4] ss:$0 sm:$0xff]  ;;  %s436_s4 = smov [#allocation11]  }
  0x24   :  { %161 = vmatpush.msra.mxu1 %v144_v11  ;;  %v272_v45 = vld [vmem:[%s510_s6] ss:$0 sm:$0xff]  ;;  %s247_s6 = sshll.u32 %s436_s4, 4  ;;  %s248_s6 = int_to_ptr.vmem [resolvable:$true] %s247_s6 }
  0x25   :  { %199 = vmatpush.msra.mxu2 %v188_v24 }
  0x26   :  { %162 = vmatpush.msra.mxu1 %v143_v12 }
  0x27   :  { %200 = vmatpush.msra.mxu2 %v187_v25 }
  0x28   :  { %163 = vmatpush.msra.mxu1 %v142_v13 }
  0x29   :  { %201 = vmatpush.msra.mxu2 %v186_v26 }
  0x2a   :  { %164 = vmatpush.msra.mxu1 %v141_v14 }
  0x2b   :  { %202 = vmatpush.msra.mxu2 %v185_v27 }
  0x2c   :  { %165 = vmatpush.msra.mxu1 %v140_v15 }
  0x2d   :  { %203 = vmatpush.msra.mxu2 %v184_v28 }
  0x2e   :  { %166 = vmatpush.msra.mxu1 %v139_v16 }
  0x2f   :  { %204 = vmatpush.msra.mxu2 %v183_v29 }
  0x30   :  { %167 = vmatpush.msra.mxu1 %v138_v17 }
  0x31   :  { %205 = vmatpush.msra.mxu2 %v182_v30 }
  0x32   :  { %168 = vmatpush.msra.mxu1 %v137_v18 }
  0x33   :  { %206 = vmatpush.msra.mxu2 %v181_v31 }
  0x34   :  { %169 = vmatpush.msra.mxu1 %v136_v19 }
  0x35   :  { %207 = vmatpush.msra.mxu2 %v180_v32 }
  0x36   :  { %170 = vmatpush.msra.mxu1 %v135_v20 }
  0x37   :  { %208 = vmatpush.msra.mxu2 %v179_v33 }
  0x39   :  { %209 = vmatpush.msra.mxu2 %v178_v38 }
  0x3b   :  { %210 = vmatpush.msra.mxu2 %v177_v39 }
  0x3d   :  { %211 = vmatpush.msra.mxu2 %v176_v40 }
  0x9b   :  { %v131_v35 = vpop.f32.mrf.mxu0 }
  0x9c   :  { %v132_v36 = vadd.f32 %v270_v34, %v131_v35 }
  0x9e   :  { %v134_v37 = vmax.f32 %v132_v36, 0.0 }
  0xa0   :  { %171 = vmatmul.f32.vlgmr.msra.gmra.mxu1 %v134_v37 }
 0x11d   :  { %v172_v42 = vpop.f32.mrf.mxu1 }
 0x11e   :  { %v173_v43 = vadd.f32 %v271_v41, %v172_v42 }
 0x120   :  { %v175_v44 = vmax.f32 %v173_v43, 0.0 }
 0x122   :  { %212 = vmatmul.f32.vlgmr.msra.gmra.mxu2 %v175_v44 }
 0x1a5   :  { %v213_v46 = vpop.f32.mrf.mxu2 }
 0x1a6   :  { %v214_v47 = vadd.f32 %v272_v45, %v213_v46 }
 0x1a8   :  { %v217_v48 = vsel %vm216_vm1, %v214_v47, -inf }
 0x1a9   :  { %218 = vmax.xlane.f32.xlu0 %v217_v48 }
 0x21c   :  { %v219_v49 = vpop.xlane.xlu0 %218 }
 0x21d   :  { %v220_v50 = vsub.f32 %v214_v47, %v219_v49 }
 0x21f   :  { %v221_v51 = vmul.f32 1.442695, %v220_v50 }
 0x221   :  { %273 = vpow2.f32 %v221_v51 }
 0x227   :  { %v274_v52 = vpop.eup %273 }
 0x228   :  { %v223_v53 = vsel %vm216_vm1, %v274_v52, 0.0 }
 0x229   :  { %224 = vadd.xlane.f32.xlu0 %v223_v53 }
 0x29c   :  { %v225_v54 = vpop.xlane.xlu0 %224 }
 0x29d   :  { %275 = vrcp.f32 %v225_v54  ;;  %v237_v58 = vand.u32 2147483648, %v225_v54  ;;  %v235_v60 = vand.u32 2147483647, %v225_v54  ;;  %vm231_vm3 = vweird.f32 %v225_v54 }
 0x29f   :  { %v238_v62 = vor.u32 1.1754944e-38, %v237_v58  ;;  %vm236_vm5 = vcmp.eq.f32.partialorder %v235_v60, 8.507059e+37 }
 0x2a3   :  { %v276_v55 = vpop.eup %275 }
 0x2a4   :  { %v227_v56 = vmul.f32 %v276_v55, %v225_v54  ;;  %vm232_vm2 = vweird.f32 %v276_v55 }
 0x2a5   :  { %vm233_vm4 = vmor %vm231_vm3, %vm232_vm2 }
 0x2a6   :  { %v228_v57 = vsub.f32 1.0, %v227_v56 }
 0x2a8   :  { %v229_v59 = vmul.f32 %v276_v55, %v228_v57 }
 0x2aa   :  { %v230_v61 = vadd.f32 %v276_v55, %v229_v59 }
 0x2ac   :  { %v234_v63 = vsel %vm233_vm4, %v276_v55, %v230_v61 }
 0x2ad   :  { %v239_v0 = vsel %vm236_vm5, %v238_v62, %v234_v63 }
 0x2ae   :  { %v240_v1 = vmul.f32 %v274_v52, %v239_v0 }
 0x2b0   :  { %241 = vst.msk [vmem:[#allocation11] sm:$0xff] %vm216_vm1, %v240_v1 }
 0x2b1   :  { %252 = dma.vmem_to_hbm [thread:$0]  %s248_s6, 128, %s250_s29, [#allocation4]  }
 0x2b2   :  { %427 = dma.done.wait [#allocation4], 128  }
 0x2b3   :  { %428 = vsyncadd [#allocation4], 4294967168 }
 0x2b4   :  { %257 = vsyncpa [#allocation3], 1 }
 0x2b5   :  { %258 = vsyncpa [#allocation6], 1 }
 0x2b6   :  { %259 = vsyncpa [#allocation9], 1 }
 0x2b7   :  { %260 = vsyncpa [#allocation4], 1 }

</bundles_post_ra>
